<compile_context>
chip_gen: v7x
topology: tpu7x:2x2x1
jax: 0.10.0
libtpu: 0.0.40
codegen_flags: <defaults>
</compile_context>

<pallas_src>
import math

import jax
import jax.numpy as jnp
from jax.experimental import pallas as pl
from jax.experimental.pallas import tpu as pltpu

_VMEM_LIMIT_BYTES = 48 * 1024 * 1024   # fits v7x (64 MiB/TC) with headroom
_TILE_TARGET_BYTES = 6 * 1024 * 1024   # per-buffer tile budget (double-buffered)


def _round_down_mult(v, m):
    return (v // m) * m


def _bias_add_kernel(x_ref, b_ref, o_ref):
    # x: (tile_r, tile_l); b: (tile_r, 1) or (1, tile_l) -> broadcast add (VPU).
    o_ref[...] = x_ref[...].astype(o_ref.dtype) + b_ref[...]


def _tile_sizes(R, L, itemsize, pack):
    """Pick (tile_r, tile_l) so a single block stays under the per-buffer budget."""
    budget = _TILE_TARGET_BYTES
    r_unit = min(pack, R)                       # smallest legal row tile
    if L * itemsize * r_unit <= budget:
        # Full rows fit: tile only the row (sublane) axis.
        tile_l = L
        tile_r = _round_down_mult(budget // (L * itemsize), pack)
        if tile_r == 0 or tile_r >= R:
            tile_r = R
    else:
        # A single row group already exceeds the budget: tile the lane axis too
        # (multiple of 128) instead of blowing VMEM with an oversized block.
        tile_r = r_unit
        tile_l = max(128, _round_down_mult(budget // (tile_r * itemsize), 128))
        if tile_l >= L:
            tile_l = L
    return tile_r, tile_l


def _broadcast_add(x2, b2, bias_axis, out_dtype):
    """out[r, l] = x2[r, l] + bias, broadcast along rows ('l') or lanes ('r').

    bias_axis == 'l': b2 has shape (1, L) (same bias row for every row).
    bias_axis == 'r': b2 has shape (R, 1) (one bias scalar per row).
    """
    R, L = x2.shape
    x_item = jnp.dtype(x2.dtype).itemsize
    o_item = jnp.dtype(out_dtype).itemsize
    itemsize = max(x_item, o_item)                       # conservative budget
    pack = max(8, 32 // max(1, min(x_item, o_item)))     # 8 f32 / 16 bf16 / 32 i8

    tile_r, tile_l = _tile_sizes(R, L, itemsize, pack)
    grid_r = pl.cdiv(R, tile_r)
    grid_l = pl.cdiv(L, tile_l)

    x_block = (tile_r, tile_l)
    b_block = (tile_r, 1) if bias_axis == 'r' else (1, tile_l)

    # Bias-dependent axis goes outermost (its block index stays fixed across the
    # inner sweep -> no redundant bias DMA).  If that axis has only one block
    # while the other has several, swap so the leading "parallel" axis still has
    # extent >= 2 (v7x megacore split).
    r_outer = (bias_axis == 'r')
    if r_outer and grid_r == 1 and grid_l > 1:
        r_outer = False
    elif (not r_outer) and grid_l == 1 and grid_r > 1:
        r_outer = True

    if r_outer:
        grid = (grid_r, grid_l)
        x_map = lambda r, l: (r, l)
        b_map = (lambda r, l: (r, 0)) if bias_axis == 'r' else (lambda r, l: (0, l))
    else:
        grid = (grid_l, grid_r)
        x_map = lambda l, r: (r, l)
        b_map = (lambda l, r: (r, 0)) if bias_axis == 'r' else (lambda l, r: (0, l))

    cost = pl.CostEstimate(
        flops=R * L, transcendentals=0,
        bytes_accessed=x2.size * x_item + b2.size * o_item + R * L * o_item)

    return pl.pallas_call(
        _bias_add_kernel,
        out_shape=jax.ShapeDtypeStruct((R, L), out_dtype),
        grid=grid,
        in_specs=[pl.BlockSpec(x_block, x_map),
                  pl.BlockSpec(b_block, b_map)],
        out_specs=pl.BlockSpec(x_block, x_map),
        compiler_params=pltpu.CompilerParams(
            dimension_semantics=("parallel", "parallel"),
            vmem_limit_bytes=_VMEM_LIMIT_BYTES),
        cost_estimate=cost,
    )(x2, b2)


class AddBias:
    """JAX/Pallas equivalent of the PyTorch AddBias module."""

    def __init__(self, bias):
        # mimic nn.Parameter(bias.unsqueeze(1)): stored as (C, 1)
        self._bias = jnp.asarray(bias).reshape(-1, 1)

    def __call__(self, x):
        x = jnp.asarray(x)
        C = self._bias.shape[0]
        out_dtype = jnp.result_type(x.dtype, self._bias.dtype)
        if x.ndim == 2:
            return self._forward_2d(x, C, out_dtype)
        # TODO(synk): only 2-D and 4-D (NCHW) inputs are supported, matching the
        # module's intended use; other ranks would need their own layout plan.
        assert x.ndim == 4, "AddBias: non-2D input must be 4D NCHW"
        return self._forward_nchw(x, C, out_dtype)

    # ---- 2D: (N, C) + (1, C) -------------------------------------------------
    def _forward_2d(self, x, C, out_dtype):
        N, Cx = x.shape
        assert Cx == C
        b_flat = self._bias.reshape(-1).astype(out_dtype)   # (C,)

        g0 = 128 // math.gcd(C, 128)    # rows to merge for a lane-dense view
        if g0 > 1 and N % g0 == 0:
            # Lane-dense repack: (N, C) -> (N/g0, C*g0); bias row host-tiled g0x.
            x2 = x.reshape(N // g0, C * g0)
            b_row = jnp.tile(b_flat, g0).reshape(1, C * g0)
            out = _broadcast_add(x2, b_row, 'l', out_dtype)
            return out.reshape(N, C)

        # C % 128 == 0 (already lane-dense) or repack impossible (N % g0 != 0):
        # run directly; tiny awkward C falls back to masked stores.
        b_row = b_flat.reshape(1, C)
        return _broadcast_add(x, b_row, 'l', out_dtype)

    # ---- 4D: (N, C, H, W) + (1, C, 1, 1) --------------------------------------
    def _forward_nchw(self, x, C, out_dtype):
        N, Cx, H, W = x.shape
        assert Cx == C
        HW = H * W
        b_flat = self._bias.reshape(-1).astype(out_dtype)   # (C,)

        # HW lane-unfriendly (7x7, 14x14, ...) but C*HW lane-dense and enough
        # batch rows: fold channels onto the lane axis.
        use_row_fold = (HW % 128 != 0) and ((C * HW) % 128 == 0) and (N >= 8)
        if use_row_fold:
            x2 = x.reshape(N, C * HW)
            b_row = jnp.repeat(b_flat, HW).reshape(1, C * HW)
            out = _broadcast_add(x2, b_row, 'l', out_dtype)
        else:
            # Column-broadcast: (N*C, HW) + (N*C, 1).  Lane-dense whenever
            # HW % 128 == 0 (16x16, 32x32, ... feature maps).
            x2 = x.reshape(N * C, HW)
            b_col = jnp.tile(b_flat.reshape(C, 1), (N, 1))   # (N*C, 1)
            out = _broadcast_add(x2, b_col, 'r', out_dtype)
        return out.reshape(N, C, H, W)


if __name__ == "__main__":
    key = jax.random.PRNGKey(0)
    keys = jax.random.split(key, 10)

    # --- small shapes matching the module's intent (batch=2, C=4, 16x16) -----
    C = 4
    bias = jax.random.normal(keys[0], (C,), dtype=jnp.float32)
    mod = AddBias(bias)

    x4 = jax.random.normal(keys[1], (2, C, 16, 16), dtype=jnp.float32)   # NCHW
    y4 = jax.block_until_ready(mod(x4))
    assert y4.shape == x4.shape and y4.dtype == x4.dtype
    assert jnp.allclose(y4, x4 + bias.reshape(1, C, 1, 1), atol=1e-6, rtol=1e-6)

    x2 = jax.random.normal(keys[2], (8, C), dtype=jnp.float32)           # (N, C)
    y2 = jax.block_until_ready(mod(x2))
    assert y2.shape == x2.shape and y2.dtype == x2.dtype
    assert jnp.allclose(y2, x2 + bias.reshape(1, C), atol=1e-6, rtol=1e-6)

    # --- lane-dense repack path: C=4, N divisible by 128/gcd(4,128)=32 --------
    x2r = jax.random.normal(keys[3], (64, C), dtype=jnp.float32)
    y2r = jax.block_until_ready(mod(x2r))
    assert jnp.allclose(y2r, x2r + bias.reshape(1, C), atol=1e-6, rtol=1e-6)

    # --- multi-step grid with a remainder row tile -----------------------------
    C2 = 640
    bias2 = jax.random.normal(keys[4], (C2,), dtype=jnp.float32)
    mod2 = AddBias(bias2)
    x2b = jax.random.normal(keys[5], (8192, C2), dtype=jnp.float32)
    y2b = jax.block_until_ready(mod2(x2b))
    assert jnp.allclose(y2b, x2b + bias2.reshape(1, C2), atol=1e-6, rtol=1e-6)

    # --- 4D, lane-dense HW (32x32), awkward channel count, N == 1 -------------
    C3 = 600
    bias3 = jax.random.normal(keys[6], (C3,), dtype=jnp.float32)
    mod3 = AddBias(bias3)
    x4b = jax.random.normal(keys[7], (1, C3, 32, 32), dtype=jnp.float32)
    y4b = jax.block_until_ready(mod3(x4b))
    assert jnp.allclose(y4b, x4b + bias3.reshape(1, C3, 1, 1), atol=1e-6, rtol=1e-6)

    # --- 4D, lane-unfriendly HW (7x7) folded onto lanes (C*HW % 128 == 0) -----
    C4 = 128
    bias4 = jax.random.normal(keys[8], (C4,), dtype=jnp.float32)
    mod4 = AddBias(bias4)
    x4c = jax.random.normal(keys[9], (8, C4, 7, 7), dtype=jnp.float32)
    y4c = jax.block_until_ready(mod4(x4c))
    assert jnp.allclose(y4c, x4c + bias4.reshape(1, C4, 1, 1), atol=1e-6, rtol=1e-6)

    print("KERNEL_OK")
</pallas_src>

<mosaic_0001>
module attributes {stable_mosaic.version = 11 : i64} {
  func.func @_bias_add_kernel(%arg0: i32, %arg1: i32, %arg2: memref<8x256xf32, #tpu.memory_space<vmem>>, %arg3: memref<8x1xf32, #tpu.memory_space<vmem>>, %arg4: memref<8x256xf32, #tpu.memory_space<vmem>>) attributes {dimension_semantics = [#tpu.dimension_semantics<parallel>, #tpu.dimension_semantics<parallel>], iteration_bounds = array<i64: 1, 1>, scalar_prefetch = 0 : i64, scratch_operands = 0 : i64, tpu.core_type = #tpu.core_type<tc>, window_params = [{transform_indices = @transform_0, window_bounds = array<i64: 8, 256>}, {transform_indices = @transform_1, window_bounds = array<i64: 8, 1>}, {transform_indices = @transform_2, window_bounds = array<i64: 8, 256>}]} {
    %c0 = arith.constant 0 : index
    %c0_0 = arith.constant 0 : index
    %0 = vector.load %arg2[%c0, %c0_0] : memref<8x256xf32, #tpu.memory_space<vmem>>, vector<8x256xf32>
    %c0_1 = arith.constant 0 : index
    %c0_2 = arith.constant 0 : index
    %1 = vector.load %arg3[%c0_1, %c0_2] : memref<8x1xf32, #tpu.memory_space<vmem>>, vector<8x1xf32>
    %2 = vector.broadcast %1 : vector<8x1xf32> to vector<8x256xf32>
    %3 = arith.addf %0, %2 : vector<8x256xf32>
    %c0_3 = arith.constant 0 : index
    %c0_4 = arith.constant 0 : index
    %4 = vector.load %arg4[%c0_3, %c0_4] : memref<8x256xf32, #tpu.memory_space<vmem>>, vector<8x256xf32>
    tpu.vector_store %arg4[%c0_3, %c0_4], %3 {strides = array<i32>} : memref<8x256xf32, #tpu.memory_space<vmem>>, vector<8x256xf32>,
    return
  }
  func.func @transform_0(%arg0: i32, %arg1: i32) -> (i32, i32) {
    %c0_i32 = arith.constant 0 : i32
    return %arg0, %arg1 : i32, i32
  }
  func.func @transform_1(%arg0: i32, %arg1: i32) -> (i32, i32) {
    %c0_i32 = arith.constant 0 : i32
    %c0_i32_0 = arith.constant 0 : i32
    return %arg0, %c0_i32 : i32, i32
  }
  func.func @transform_2(%arg0: i32, %arg1: i32) -> (i32, i32) {
    %c0_i32 = arith.constant 0 : i32
    return %arg0, %arg1 : i32, i32
  }
}

</mosaic_0001>

<bundles_post_ra>
// kernel: tpu_custom_call.1
= control target key start
LH: loop header
LB: loop body
LE: loop exit
PB: predicated region body
PF: predicated region fallthrough
CT: control target
= control target key end

     0   :  { %7 = vsyncpa [#allocation3], 0  ;;  %s148_s0 = inlined_call_operand.hbm [shape: f32[8,256], index: 0, kind: input, shape index: {}]   ;;  %s149_s1 = inlined_call_operand.vmem [shape: f32[8,1], index: 1, kind: input, shape index: {}]   ;;  %s150_s2 = inlined_call_operand.hbm [shape: f32[8,256], index: 2, kind: output, shape index: {}]  }
   0x1   :  { %8 = vsyncpa [#allocation4], 0  ;;  %s103_s9 = smov [#allocation2]   ;;  %s55_s13 = scalar_lea.hbm %s148_s0, 256 }
   0x2   :  { %s15_s10 = sshll.u32 %s103_s9, 4  ;;  %p56_p0 = scmp.ne.s32.totalorder %s148_s0, %s55_s13  ;;  %s16_s10 = int_to_ptr.vmem [resolvable:$true] %s15_s10 }
   0x3   :  { %p59_p1 = scmp.lt.u32.totalorder %s55_s13, %s148_s0 }
   0x5   :  { %p61_p2 = pnand %p59_p1, %p56_p0 }
   0x7   :  { %64 = shalt.err (!%p61_p2)
}
   0x8   :  { %s65_s18 = scalar_lea.vmem %s16_s10, 256  ;;  %p70_p4 = scmp.lt.s32.totalorder %s16_s10, %s16_s10 }
   0x9   :  { %p66_p3 = scmp.ne.s32.totalorder %s16_s10, %s65_s18  ;;  %p71_p5 = scmp.lt.s32.totalorder %s65_s18, %s65_s18 }
   0xb   :  { %p72_p6 = por %p71_p5, %p70_p4 }
   0xd   :  { %p73_p7 = pnand %p72_p6, %p66_p3 }
   0xf   :  { %76 = shalt.err (!%p73_p7)
}
  0x10   :  { %18 = dma.hbm_to_vmem [thread:$0]  %s148_s0, 256, %s16_s10, [#allocation3]  }
  0x11   :  { %99 = dma.done.wait [#allocation3], 256  }
  0x12   :  { %100 = vsyncadd [#allocation3], 4294967040  ;;  %v104_v0 = vmov 0   ;;  %v26_v1 = vld [vmem:[%s149_s1] sm:$0xff]  ;;  %v25_v3 = vld [vmem:[#allocation2 + $0x8] sm:$0xff]  ;;  %s105_s23 = smov [#allocation5]  }
  0x13   :  { %54 = vset.pattern.permute.xlu0 %v104_v0  ;;  %v24_v2 = vld [vmem:[#allocation2] sm:$0xff]  ;;  %s42_s24 = sshll.u32 %s105_s23, 4  ;;  %s43_s24 = int_to_ptr.vmem [resolvable:$true] %s42_s24 }
  0x14   :  { %29 = vperm.xlu0 %54, %v26_v1   ;;  %s77_s0 = scalar_lea.vmem %s43_s24, 256  ;;  %p82_p9 = scmp.lt.s32.totalorder %s43_s24, %s43_s24 }
  0x15   :  { %p78_p8 = scmp.ne.s32.totalorder %s43_s24, %s77_s0  ;;  %p83_p10 = scmp.lt.s32.totalorder %s77_s0, %s77_s0 }
  0x17   :  { %p84_p11 = por %p83_p10, %p82_p9 }
  0x19   :  { %p85_p12 = pnand %p84_p11, %p78_p8 }
  0x93   :  { %v30_v4 = vpop.permute.xlu0 %29 }
  0x94   :  { %v32_v5 = vadd.f32 %v30_v4, %v24_v2  ;;  %v33_v6 = vadd.f32 %v30_v4, %v25_v3 }
  0x96   :  { %34 = vst [vmem:[#allocation5] sm:$0xff] %v32_v5  ;;  %35 = vst [vmem:[#allocation5 + $0x8] sm:$0xff] %v33_v6 }
  0x97   :  { %88 = shalt.err (!%p85_p12)
}
  0x98   :  { %s89_s26 = scalar_lea.hbm %s150_s2, 256 }
  0x99   :  { %p90_p13 = scmp.ne.s32.totalorder %s150_s2, %s89_s26  ;;  %p93_p0 = scmp.lt.u32.totalorder %s89_s26, %s150_s2 }
  0x9b   :  { %p95_p1 = pnand %p93_p0, %p90_p13 }
  0x9d   :  { %98 = shalt.err (!%p95_p1)
}
  0x9e   :  { %45 = dma.vmem_to_hbm [thread:$0]  %s43_s24, 256, %s150_s2, [#allocation4]  }
  0x9f   :  { %101 = dma.done.wait [#allocation4], 256  }
  0xa0   :  { %102 = vsyncadd [#allocation4], 4294967040 }
  0xa1   :  { %49 = vsyncpa [#allocation3], 1 }
  0xa2   :  { %50 = vsyncpa [#allocation4], 1 }

</bundles_post_ra>
